<compile_context>
chip_gen: v5e
topology: v5e:2x2
jax: 0.10.0
libtpu: 0.0.40
codegen_flags: <defaults>
</compile_context>

<pallas_src>
import functools

import jax
import jax.numpy as jnp
from jax import lax
from jax.experimental import pallas as pl
from jax.experimental.pallas import tpu as pltpu

# Small synthetic dims (real module: n_embd=384, block_size=258; scaled down, same math).
N_EMBD = 32
HEAD_SIZE = 16

MASK_VALUE = -1e30  # finite "-inf": exp underflows to exactly 0 -> NaN-free, same result as -inf


def head_kernel(x_ref, w_ref, o_ref, *, approx_softmax):
    """One grid step: full causal attention for a block of Bb batch rows.

    x_ref : (Bb, T, C)  float32 (cast to the MXU operand dtype in-kernel)
    w_ref : (3, C, H)   operand dtype; [wk, wq * H**-0.5, wv] (score scale folded into Q)
    o_ref : (Bb, T, H)  float32
    """
    op_dtype = w_ref.dtype
    x = x_ref[...].astype(op_dtype)            # in-kernel cast: x DMA'd once, as f32

    proj = (((2,), (0,)), ((), ()))            # (Bb,T,C) @ (C,H) -> (Bb,T,H)
    k = lax.dot_general(x, w_ref[0], proj, preferred_element_type=jnp.float32)
    q = lax.dot_general(x, w_ref[1], proj, preferred_element_type=jnp.float32)
    v = lax.dot_general(x, w_ref[2], proj, preferred_element_type=jnp.float32)

    # Scores: batched contraction over the head dim (no explicit k transpose / XLU copy).
    s = lax.dot_general(
        q.astype(op_dtype), k.astype(op_dtype),
        dimension_numbers=(((2,), (2,)), ((0,), (0,))),
        preferred_element_type=jnp.float32)                        # (Bb, T, T)

    # Causal mask from a single 2-D iota compare, broadcast over the batch dim.
    T = s.shape[-1]
    rows = lax.broadcasted_iota(jnp.int32, (T, T), 0)
    cols = lax.broadcasted_iota(jnp.int32, (T, T), 1)
    s = jnp.where((cols <= rows)[None, :, :], s, MASK_VALUE)

    # Numerically stable softmax (max / sum stay f32).
    m = jnp.max(s, axis=-1, keepdims=True)
    if approx_softmax:
        # bf16 exp (EUP bf16 path on v6e/v7x) + approximate EUP reciprocal.
        e = jnp.exp((s - m).astype(jnp.bfloat16))
        denom = jnp.sum(e.astype(jnp.float32), axis=-1, keepdims=True)
        p = (e * pl.reciprocal(denom, approx=True).astype(jnp.bfloat16)).astype(op_dtype)
    else:
        # Exact path: f32 exp and a true divide (strict parity with the reference softmax).
        e = jnp.exp(s - m)
        p = (e / jnp.sum(e, axis=-1, keepdims=True)).astype(op_dtype)

    # Attention output, f32 accumulation, exact (unpadded) store.
    out = lax.dot_general(
        p, v.astype(op_dtype),
        dimension_numbers=(((2,), (1,)), ((0,), (0,))),
        preferred_element_type=jnp.float32)                        # (Bb, T, H)
    o_ref[...] = out.astype(o_ref.dtype)


def _vmem_estimate_bytes(Bb, T, C, H):
    f32 = 4
    x_blocks = 2 * Bb * T * C * f32          # double-buffered f32 input block
    out_blocks = 2 * Bb * T * H * f32        # double-buffered f32 output block
    weights = 2 * 3 * C * H * f32
    qkv = 3 * Bb * T * H * f32               # k, q, v f32 accumulators
    scores = 4 * Bb * T * T * f32            # s / e / p intermediates + slack
    return x_blocks + out_blocks + weights + qkv + scores


def _pick_batch_block(B, T, C, H, requested, vmem_budget=40 << 20):
    """Largest divisor of B that (a) leaves >= 2 grid steps when B >= 2 (keeps both
    v7x TensorCores busy) and (b) keeps the per-step VMEM footprint under budget
    (v7x: 64 MiB physical VMEM). Divisors only -> no batch padding or output slicing."""
    divisors = [d for d in range(1, B + 1) if B % d == 0]
    cap = max(1, min(requested, B // 2 if B >= 2 else 1))
    bb = max(d for d in divisors if d <= cap)
    while bb > 1 and _vmem_estimate_bytes(bb, T, C, H) > vmem_budget:
        bb = max(d for d in divisors if d < bb)
    return bb


def head_forward(x, wk, wq, wv, *, batch_block=8, operand_dtype=jnp.bfloat16):
    """Causal single-head self-attention matching PyTorch `Head.forward`.

    x: (B, T, C) float32; wk/wq/wv: (C, H) (nn.Linear weight transposed).
    Returns (B, T, H) float32.
    """
    B, T, C = x.shape
    H = wk.shape[1]
    assert wk.shape == wq.shape == wv.shape == (C, H)

    # Trace-time weight prep (tiny, one-off): stack [K | Q*scale | V]; the 1/sqrt(H)
    # score scale is folded into the Q weights (one (C,H) scale vs. a (T,T) pass/step).
    scale = jnp.float32(H) ** jnp.float32(-0.5)
    w = jnp.stack([wk.astype(jnp.float32),
                   wq.astype(jnp.float32) * scale,
                   wv.astype(jnp.float32)], axis=0).astype(operand_dtype)      # (3, C, H)

    Bb = _pick_batch_block(B, T, C, H, batch_block)
    vmem_limit = int(min(64 << 20,
                         max(32 << 20, _vmem_estimate_bytes(Bb, T, C, H) + (8 << 20))))

    kernel = functools.partial(head_kernel,
                               approx_softmax=(operand_dtype == jnp.bfloat16))

    return pl.pallas_call(
        kernel,
        out_shape=jax.ShapeDtypeStruct((B, T, H), jnp.float32),
        grid_spec=pltpu.PrefetchScalarGridSpec(
            num_scalar_prefetch=0,
            grid=(B // Bb,),
            in_specs=[
                # x stays f32 in HBM: no wrapper cast/pad pass; (T, C) use the
                # "equal to full array dim" form of the (8,128) block rule.
                pl.BlockSpec((Bb, T, C), lambda b: (b, 0, 0)),
                pl.BlockSpec((3, C, H), lambda b: (0, 0, 0)),    # weights stay resident
            ],
            out_specs=pl.BlockSpec((Bb, T, H), lambda b: (b, 0, 0)),
        ),
        compiler_params=pltpu.CompilerParams(
            dimension_semantics=("parallel",),   # megacore / 2-TC split over batch blocks
            vmem_limit_bytes=vmem_limit),
    )(x, w)


def head_reference(x, wk, wq, wv):
    # Pure-JAX f32 reference mirroring the PyTorch forward exactly.
    k = x @ wk
    q = x @ wq
    v = x @ wv
    wei = (q @ jnp.swapaxes(k, -2, -1)) * (k.shape[-1] ** -0.5)
    T = x.shape[1]
    tril = jnp.tril(jnp.ones((T, T), dtype=bool))
    wei = jnp.where(tril, wei, -jnp.inf)
    wei = jax.nn.softmax(wei, axis=-1)
    return wei @ v


if __name__ == "__main__":
    key = jax.random.PRNGKey(0)
    kx, kk, kq, kv = jax.random.split(key, 4)

    B, T = 2, 8
    x = jax.random.normal(kx, (B, T, N_EMBD), dtype=jnp.float32)

    # Deterministic parameters, stored as (C, H) (i.e. nn.Linear weight transposed).
    w_scale = N_EMBD ** -0.5
    wk = jax.random.normal(kk, (N_EMBD, HEAD_SIZE), dtype=jnp.float32) * w_scale
    wq = jax.random.normal(kq, (N_EMBD, HEAD_SIZE), dtype=jnp.float32) * w_scale
    wv = jax.random.normal(kv, (N_EMBD, HEAD_SIZE), dtype=jnp.float32) * w_scale

    ref = head_reference(x, wk, wq, wv)

    # Fast path: bf16 MXU operands + bf16 exp + approx EUP reciprocal, f32 accumulation.
    out = jax.block_until_ready(head_forward(x, wk, wq, wv))
    assert out.shape == (B, T, HEAD_SIZE)
    assert jnp.allclose(out, ref, atol=6e-2, rtol=6e-2)

    # Full-precision operand path: f32 exp + exact divide for tight parity with PyTorch.
    out_f32 = jax.block_until_ready(
        head_forward(x, wk, wq, wv, operand_dtype=jnp.float32))
    assert jnp.allclose(out_f32, ref, atol=1e-2, rtol=1e-2)

    print("KERNEL_OK")
</pallas_src>

<mosaic_0001>
module attributes {stable_mosaic.version = 11 : i64} {
  func.func @head_kernel(%arg0: i32, %arg1: memref<1x8x32xf32, #tpu.memory_space<vmem>>, %arg2: memref<3x32x16xbf16, #tpu.memory_space<vmem>>, %arg3: memref<1x8x16xf32, #tpu.memory_space<vmem>>) attributes {dimension_semantics = [#tpu.dimension_semantics<parallel>], iteration_bounds = array<i64: 2>, scalar_prefetch = 0 : i64, scratch_operands = 0 : i64, tpu.core_type = #tpu.core_type<tc>, window_params = [{transform_indices = @transform_0, window_bounds = array<i64: 1, 8, 32>}, {pipeline_mode = #tpu.pipeline_mode<synchronous>, transform_indices = @transform_1, window_bounds = array<i64: 3, 32, 16>}, {transform_indices = @transform_2, window_bounds = array<i64: 1, 8, 16>}]} {
    %c0 = arith.constant 0 : index
    %c0_0 = arith.constant 0 : index
    %c0_1 = arith.constant 0 : index
    %0 = vector.load %arg1[%c0, %c0_0, %c0_1] : memref<1x8x32xf32, #tpu.memory_space<vmem>>, vector<1x8x32xf32>
    %1 = arith.truncf %0 : vector<1x8x32xf32> to vector<1x8x32xbf16>
    %c0_2 = arith.constant 0 : index
    %c0_3 = arith.constant 0 : index
    %c0_4 = arith.constant 0 : index
    %2 = vector.load %arg2[%c0_2, %c0_3, %c0_4] : memref<3x32x16xbf16, #tpu.memory_space<vmem>>, vector<1x32x16xbf16>
    %3 = vector.shape_cast %2 : vector<1x32x16xbf16> to vector<32x16xbf16>
    %cst = arith.constant dense<0.000000e+00> : vector<1x8x16xf32>
    %4 = tpu.matmul %1, %3, %cst {dimension_numbers = #tpu.dot_dimension_numbers<[2], [0], [0, 1], [1], [0, 0, 0, 1, 1, 1], [], []>} : vector<1x8x32xbf16>, vector<32x16xbf16>, vector<1x8x16xf32> -> vector<1x8x16xf32>
    %c1 = arith.constant 1 : index
    %c0_5 = arith.constant 0 : index
    %c0_6 = arith.constant 0 : index
    %5 = vector.load %arg2[%c1, %c0_5, %c0_6] : memref<3x32x16xbf16, #tpu.memory_space<vmem>>, vector<1x32x16xbf16>
    %6 = vector.shape_cast %5 : vector<1x32x16xbf16> to vector<32x16xbf16>
    %cst_7 = arith.constant dense<0.000000e+00> : vector<1x8x16xf32>
    %7 = tpu.matmul %1, %6, %cst_7 {dimension_numbers = #tpu.dot_dimension_numbers<[2], [0], [0, 1], [1], [0, 0, 0, 1, 1, 1], [], []>} : vector<1x8x32xbf16>, vector<32x16xbf16>, vector<1x8x16xf32> -> vector<1x8x16xf32>
    %c2 = arith.constant 2 : index
    %c0_8 = arith.constant 0 : index
    %c0_9 = arith.constant 0 : index
    %8 = vector.load %arg2[%c2, %c0_8, %c0_9] : memref<3x32x16xbf16, #tpu.memory_space<vmem>>, vector<1x32x16xbf16>
    %9 = vector.shape_cast %8 : vector<1x32x16xbf16> to vector<32x16xbf16>
    %cst_10 = arith.constant dense<0.000000e+00> : vector<1x8x16xf32>
    %10 = tpu.matmul %1, %9, %cst_10 {dimension_numbers = #tpu.dot_dimension_numbers<[2], [0], [0, 1], [1], [0, 0, 0, 1, 1, 1], [], []>} : vector<1x8x32xbf16>, vector<32x16xbf16>, vector<1x8x16xf32> -> vector<1x8x16xf32>
    %11 = arith.truncf %7 : vector<1x8x16xf32> to vector<1x8x16xbf16>
    %12 = arith.truncf %4 : vector<1x8x16xf32> to vector<1x8x16xbf16>
    %cst_11 = arith.constant dense<0.000000e+00> : vector<1x8x8xf32>
    %13 = tpu.matmul %11, %12, %cst_11 {dimension_numbers = #tpu.dot_dimension_numbers<[2], [2], [1], [1], [0, 0, 0, 1, 1, 1], [0], [0]>} : vector<1x8x16xbf16>, vector<1x8x16xbf16>, vector<1x8x8xf32> -> vector<1x8x8xf32>
    %14 = tpu.iota {dimensions = array<i32: 0>} : vector<8x8xi32>
    %15 = tpu.iota {dimensions = array<i32: 1>} : vector<8x8xi32>
    %16 = arith.cmpi sle, %15, %14 : vector<8x8xi32>
    %17 = vector.shape_cast %16 : vector<8x8xi1> to vector<1x8x8xi1>
    %cst_12 = arith.constant -1.000000e+30 : f32
    %18 = vector.broadcast %cst_12 : f32 to vector<1x8x8xf32>
    %19 = arith.select %17, %13, %18 : vector<1x8x8xi1>, vector<1x8x8xf32>
    %cst_13 = arith.constant dense<0xFF800000> : vector<1x8xf32>
    %20 = vector.multi_reduction <maximumf>, %19, %cst_13 [2] : vector<1x8x8xf32> to vector<1x8xf32>
    %21 = vector.shape_cast %20 : vector<1x8xf32> to vector<1x8x1xf32>
    %22 = vector.broadcast %21 : vector<1x8x1xf32> to vector<1x8x8xf32>
    %23 = arith.subf %19, %22 : vector<1x8x8xf32>
    %24 = arith.truncf %23 : vector<1x8x8xf32> to vector<1x8x8xbf16>
    %25 = math.exp %24 : vector<1x8x8xbf16>
    %26 = arith.extf %25 : vector<1x8x8xbf16> to vector<1x8x8xf32>
    %cst_14 = arith.constant dense<0.000000e+00> : vector<1x8xf32>
    %27 = vector.multi_reduction <add>, %26, %cst_14 [2] : vector<1x8x8xf32> to vector<1x8xf32>
    %28 = vector.shape_cast %27 : vector<1x8xf32> to vector<1x8x1xf32>
    %29 = tpu.reciprocal %28 {approx = true} : vector<1x8x1xf32> -> vector<1x8x1xf32>
    %30 = arith.truncf %29 : vector<1x8x1xf32> to vector<1x8x1xbf16>
    %31 = vector.broadcast %30 : vector<1x8x1xbf16> to vector<1x8x8xbf16>
    %32 = arith.mulf %25, %31 : vector<1x8x8xbf16>
    %33 = arith.truncf %10 : vector<1x8x16xf32> to vector<1x8x16xbf16>
    %cst_15 = arith.constant dense<0.000000e+00> : vector<1x8x16xf32>
    %34 = tpu.matmul %32, %33, %cst_15 {dimension_numbers = #tpu.dot_dimension_numbers<[2], [1], [1], [2], [0, 0, 0, 1, 1, 2], [0], [0]>} : vector<1x8x8xbf16>, vector<1x8x16xbf16>, vector<1x8x16xf32> -> vector<1x8x16xf32>
    %c0_16 = arith.constant 0 : index
    %c0_17 = arith.constant 0 : index
    %c0_18 = arith.constant 0 : index
    %35 = vector.load %arg3[%c0_16, %c0_17, %c0_18] : memref<1x8x16xf32, #tpu.memory_space<vmem>>, vector<1x8x16xf32>
    tpu.vector_store %arg3[%c0_16, %c0_17, %c0_18], %34 {strides = array<i32>} : memref<1x8x16xf32, #tpu.memory_space<vmem>>, vector<1x8x16xf32>,
    return
  }
  func.func @transform_0(%arg0: i32) -> (i32, i32, i32) {
    %c0_i32 = arith.constant 0 : i32
    %c0_i32_0 = arith.constant 0 : i32
    %c0_i32_1 = arith.constant 0 : i32
    return %arg0, %c0_i32, %c0_i32_0 : i32, i32, i32
  }
  func.func @transform_1(%arg0: i32) -> (i32, i32, i32) {
    %c0_i32 = arith.constant 0 : i32
    %c0_i32_0 = arith.constant 0 : i32
    %c0_i32_1 = arith.constant 0 : i32
    %c0_i32_2 = arith.constant 0 : i32
    return %c0_i32, %c0_i32_0, %c0_i32_1 : i32, i32, i32
  }
  func.func @transform_2(%arg0: i32) -> (i32, i32, i32) {
    %c0_i32 = arith.constant 0 : i32
    %c0_i32_0 = arith.constant 0 : i32
    %c0_i32_1 = arith.constant 0 : i32
    return %arg0, %c0_i32, %c0_i32_0 : i32, i32, i32
  }
}

</mosaic_0001>

<bundles_post_ra>
// kernel: tpu_custom_call.1
= control target key start
LH: loop header
LB: loop body
LE: loop exit
PB: predicated region body
PF: predicated region fallthrough
CT: control target
= control target key end

     0   :  { %7 = vsyncpa [#allocation3], 0  ;;  %s666_s0 = inlined_call_operand.vmem [shape: f32[2,8,32], index: 0, kind: input, shape index: {}]   ;;  %s667_s1 = inlined_call_operand.vmem [shape: bf16[3,32,16], index: 1, kind: input, shape index: {}]   ;;  %s668_s2 = inlined_call_operand.hbm [shape: f32[2,8,16], index: 2, kind: output, shape index: {}]  }
   0x1   :  { %9 = vsyncpa [#allocation3 + $0x1], 0  ;;  %s554_s9 = smov 0   ;;  %s556_s10 = smov 0  }
   0x2   :  { %s558_s11 = smov 0   ;;  %s560_s12 = smov 0  }
   0x3 LB: > { %s575_s13 = sadd.s32 4294967295, %s537_s12   ;;  %s379_s14 = sadd.s32 4294967294, %s537_s12   ;;  %s537_s12 = sphi %s560_s12, %s674_s12   ;;  %s533_s11 = sphi %s558_s11, %s673_s11   ;;  %s529_s10 = sphi %s556_s10, %s672_s10   ;;  %s525_s9 = sphi %s554_s9, %s671_s9  }
   0x4   : > { %s579_s15 = sadd.s32 1, %s537_s12   ;;  %s69_s16 = sadd.s32 1, %s533_s11 }
   0x5   : > { %s66_s17 = ssub.s32 %s537_s12, %s579_s15  ;;  %p79_p0 = scmp.ne.s32.totalorder %s533_s11, %s529_s10 }
   0x6   : > { %p67_p1 = scmp.eq.s32.totalorder %s66_s17, 0  ;;  %p80_p2 = scmp.eq.s32.totalorder %s575_s13, 1 }
   0x7   : > { %p85_p3 = scmp.ne.s32.totalorder %s529_s10, %s525_s9  ;;  %p86_p4 = scmp.eq.s32.totalorder %s379_s14, 1 }
   0x8   : > { %s590_s18 = scalar_select %p67_p1, %s533_s11, %s69_s16  }
   0x9   : > { %p592_p5 = por %p80_p2, %p79_p0  ;;  %p596_p6 = por %p86_p4, %p85_p3 }
   0xa   : > { %p382_p7 = scmp.ge.s32.totalorder %s537_s12, 1  ;;  %p114_p8 = scmp.lt.s32.totalorder %s537_s12, 3 }
   0xc   : > { %p115_p9 = pnand %p382_p7, %p114_p8 }
   0xd   : > { %p135_p10 = scmp.lt.s32.totalorder (!%p115_p9), %s575_s13, 1  ;;  %s132_s16 = sand.u32 (!%p115_p9), 1, %s529_s10  }
   0xe   : > { %118 = sbr.rel (%p115_p9) target bundleno = 698 (0x2ba), region = 28  ;;  %s423_s17 = sshll.u32 (!%p115_p9), %s575_s13, 3 }
   0xf   : > { %s383_s21 = sshll.u32 (!%p115_p9), %s132_s16, 3  ;;  %s315_s24 = scalar_lea.hbm (!%p115_p9), %s668_s2, %s423_s17 }
  0x10   : > { %s134_s25 = scalar_lea.vmem (!%p115_p9), [#allocation2], %s383_s21  ;;  %s319_s27 = sshll.u32 (!%p115_p9), %s315_s24, 4  ;;  %s320_s27 = int_to_ptr.hbm [resolvable:$true] %s319_s27 }
  0x11   : > { %s317_s26 = sshll.u32 (!%p115_p9), %s134_s25, 4  ;;  %s305_s28 = scalar_lea.sflag (!%p115_p9), [#allocation3], %s132_s16  ;;  %s318_s26 = int_to_ptr.vmem [resolvable:$true] %s317_s26 }
  0x12   : > { %s495_s4 = scalar_lea.hbm (!%p115_p9), %s668_s2, 16 }
  0x13   : > { %v427_v0 = vld [vmem:[%s667_s1 + $0x8] sm:$0xff]  ;;  %v429_v1 = vld [vmem:[%s667_s1 + $0x18] sm:$0xff]  ;;  %v426_v2 = vld [vmem:[%s667_s1] sm:$0xff]  ;;  %s136_s29 = scalar_select %p135_p10, %s575_s13, 1  ;;  %vm158_vm0 = vcmask 261120   ;;  %vm237_vm1 = vcmask 130048   ;;  %v257_v15 = vlaneseq }
  0x14   : > { %168 = vmatpush.bf16.msra.mxu0 %v427_v0  ;;  %198 = vmatpush.bf16.msra.mxu1 %v429_v1  ;;  %v428_v3 = vld [vmem:[%s667_s1 + $0x10] sm:$0xff]  ;;  %v431_v13 = vld [vmem:[%s667_s1 + $0x28] sm:$0xff]  ;;  %v430_v14 = vld [vmem:[%s667_s1 + $0x20] sm:$0xff]  ;;  %vm263_vm3 = vcmask 64512   ;;  %vm286_vm4 = vcmask 1043456  }
  0x15   : > { %s384_s30 = sshll.u32 %s136_s29, 3  ;;  %228 = vmatpush.bf16.msra.mxu2 %v431_v13  ;;  %v258_v16 = vshrl.u32 %v257_v15, 7  ;;  %v260_v17 = vand.u32 127, %v257_v15  ;;  %s489_s29 = sshra.s32 %s320_s27, 4  ;;  %s490_s29 = int_to_ptr.hbm [resolvable:$true] %s489_s29 }
  0x16   : > { %s138_s5 = scalar_lea.vmem %s666_s0, %s384_s30  ;;  %s491_s30 = scalar_lea.hbm %s490_s29, 8 }
  0x17   : > { %v140_v4 = vld [vmem:[%s138_s5] sm:$0xff]  ;;  %vm261_vm2 = vcmp.le.s32.totalorder %v260_v17, %v258_v16  ;;  %p492_p11 = scmp.ne.s32.totalorder %s490_s29, %s491_s30  ;;  %p496_p0 = scmp.lt.s32.totalorder %s490_s29, %s668_s2 }
  0x18   : > { %169 = vmatpush.bf16.msra.mxu0 %v426_v2  ;;  %199 = vmatpush.bf16.msra.mxu1 %v428_v3  ;;  %v141_v5 = vpack.c.bf16 %v140_v4, %v140_v4  ;;  %p497_p1 = scmp.lt.s32.totalorder %s495_s4, %s491_s30 }
  0x19   : > { %229 = vmatpush.bf16.msra.mxu2 %v430_v14  ;;  %p493_p12 = pnand %p492_p11, %p592_p5 }
  0x1a   : > { %p498_p2 = por %p497_p1, %p496_p0 }
  0x1b   : > { %393 = vmatmul.msk.bf16.vlgmr.msra.gmra.mxu0 %vm158_vm0, %v141_v5  ;;  %406 = vmatmul.msk.bf16.vlgmr.msra.gmra.mxu1 %vm158_vm0, %v141_v5  ;;  %p494_p13 = pneg %p493_p12 }
  0x1c   : > { %419 = vmatmul.msk.bf16.vlgmr.msra.gmra.mxu2 %vm158_vm0, %v141_v5 }
  0x1d   : > { %p499_p3 = pnand %p498_p2, %p494_p13 }
  0x98   : > { %v171_v6 = vpop.f32.mrf.mxu0  ;;  %v201_v7 = vpop.f32.mrf.mxu1 }
  0x99   : > { %v236_v8 = vpack.c.bf16 %v171_v6, %v171_v6  ;;  %v235_v10 = vpack.c.bf16 %v201_v7, %v201_v7 }
  0x9b   : > { %v242_v9 = vsel %vm237_vm1, %v236_v8, 0 }
  0x9c   : > { %251 = vmatpush.bf16.xpose.msra.mxu3 %v242_v9 }
  0x9f   : > { %v231_v22 = vpop.f32.mrf.mxu2 }
  0xa0   : > { %v173_v11 = vpop.f32.mrf.mxu0  ;;  %v203_v12 = vpop.f32.mrf.mxu1  ;;  %v282_v23 = vpack.c.bf16 %v231_v22, %v231_v22 }
  0xa2   : > { %v288_v26 = vsel %vm286_vm4, %v282_v23, 0 }
  0xa3   : > { %420 = vmatmul.msk.bf16.vlgmr.msra.gmra.mxu3 %vm237_vm1, %v235_v10  ;;  %297 = vmatpush.bf16.msrb.mxu0 %v288_v26 }
  0xa7   : > { %v233_v29 = vpop.f32.mrf.mxu2 }
 0x126   : > { %v253_v18 = vpop.f32.mrf.mxu3 }
 0x127   : > { %v262_v19 = vsel %vm261_vm2, %v253_v18, -1e+30 }
 0x128   : > { %v264_v20 = vsel %vm263_vm3, %v262_v19, -inf }
 0x129   : > { %265 = vmax.xlane.f32.xlu0 %v264_v20 }
 0x12e   : > { %v255_v21 = vpop.f32.mrf.mxu3 }
 0x19c   : > { %v266_v24 = vpop.xlane.xlu0 %265 }
 0x19d   : > { %v267_v25 = vsub.f32 %v262_v19, %v266_v24 }
 0x19f   : > { %v268_v27 = vpack.c.bf16 %v267_v25, %v267_v25 }
 0x1a1   : > { %v269_v28 = vunpack.c.l.bf16 %v268_v27 }
 0x1a3   : > { %v270_v30 = vmul.f32 1.442695, %v269_v28 }
 0x1a5   : > { %471 = vpow2.f32 %v270_v30 }
 0x1ab   : > { %v472_v31 = vpop.eup %471 }
 0x1ac   : > { %v272_v32 = vpack.c.bf16 %v472_v31, %v472_v31 }
 0x1ae   : > { %v273_v33 = vunpack.c.l.bf16 %v272_v32 }
 0x1b0   : > { %v274_v34 = vsel %vm263_vm3, %v273_v33, 0.0 }
 0x1b1   : > { %275 = vadd.xlane.f32.xlu0 %v274_v34 }
 0x224   : > { %v276_v35 = vpop.xlane.xlu0 %275 }
 0x225   : > { %473 = vrcp.f32 %v276_v35 }
 0x22b   : > { %v474_v36 = vpop.eup %473 }
 0x22c   : > { %v278_v37 = vpack.c.bf16 %v474_v36, %v474_v36 }
 0x22e   : > { %v279_v38 = vunpack.c.l.bf16 %v278_v37 }
 0x230   : > { %v280_v39 = vmul.f32 %v279_v38, %v273_v33 }
 0x232   : > { %v281_v40 = vpack.c.bf16 %v280_v39, %v280_v39 }
 0x234   : > { %421 = vmatmul.msk.bf16.vlgmr.msrb.gmra.mxu0 %vm263_vm3, %v281_v40 }
 0x2b1   : > { %v299_v41 = vpop.f32.mrf.mxu0 }
 0x2b2   : > { %303 = vst.msk [vmem:[%s134_s25] sm:$0xff] %vm237_vm1, %v299_v41 }
 0x2b3   : > { %502 = shalt.err (!%p499_p3)
}
 0x2b4   : > { %432 = dma.vmem_to_hbm [thread:$0]  (%p592_p5), %s318_s26, 128, %s320_s27, %s305_s28  }
 0x2b9   : > { %v301_v42 = vpop.f32.mrf.mxu0 }
 0x2ba PF: > { %p438_p4 = scmp.ge.s32.totalorder %s537_s12, 2  ;;  %s331_s7 = sand.u32 1, %s525_s9  }
 0x2bb   : > { %s332_s8 = scalar_lea.sflag [#allocation3], %s331_s7 }
 0x2bc   : > { %p435_p7 = pnand %p438_p4, %p596_p6 }
 0x2be   : > { %p436_p8 = pneg %p435_p7 }
 0x2c0   : > { %520 = dma.done.wait (%p436_p8), %s332_s8, 128  }
 0x2c1   : > { %522 = vsyncadd (%p436_p8), %s332_s8, 4294967168  ;;  %p12_p9 = scmp.ge.s32.totalorder %s579_s15, 4   ;;  %s671_s9 = smov %s529_s10 }
 0x2c2   : > { %s672_s10 = smov %s533_s11  ;;  %s673_s11 = smov %s590_s18 }
 0x2c3   : > { %s674_s12 = smov %s579_s15  ;;  %14 = sbr.rel (!%p12_p9) target bundleno = 3 (0x3), region = 65 }
 0x2c8   :  { %338 = vsyncpa [#allocation3], 1 }
 0x2c9   :  { %340 = vsyncpa [#allocation3 + $0x1], 1 }

</bundles_post_ra>
